<compile_context>
chip_gen: v5e
topology: v5e:2x2
jax: 0.10.0
libtpu: 0.0.40
codegen_flags: <defaults>
</compile_context>

<pallas_src>
import functools

import jax
import jax.numpy as jnp
from jax.experimental import pallas as pl
from jax.experimental.pallas import tpu as pltpu

SUBLANE = 8  # f32 vreg sublane count (batch-tile granule)


def _round_up(x, m):
    return (x + m - 1) // m * m


def _actor_kernel(x_ref,
                  w1_ref, b1_ref,
                  w2_ref, b2_ref,
                  w3_ref, b3_ref,
                  w4_ref, b4_ref,
                  out_ref):
    """One batch tile through the fused 4-layer MLP (everything in VMEM)."""

    def layer(h, w_ref, b_ref, act):
        w = w_ref[...]
        # Weights were pre-cast in the wrapper (bf16 or f32); only the small
        # activation tile is cast here. Accumulate in f32, bias/act in f32.
        y = jnp.dot(h.astype(w.dtype), w, preferred_element_type=jnp.float32)
        return act(y + b_ref[...])

    h = x_ref[...]
    h = layer(h, w1_ref, b1_ref, lambda v: jnp.maximum(v, 0.0))   # relu
    h = layer(h, w2_ref, b2_ref, lambda v: jnp.maximum(v, 0.0))   # relu
    h = layer(h, w3_ref, b3_ref, lambda v: jnp.maximum(v, 0.0))   # relu
    h = layer(h, w4_ref, b4_ref, jnp.tanh)                        # tanh
    out_ref[...] = h.astype(out_ref.dtype)


@functools.partial(jax.jit, static_argnames=("tile_b", "use_bf16"))
def actor_forward(state, params, *, tile_b=2048, use_bf16=True):
    """state: (B, state_size) f32.  params: list of (W:(in,out), b:(1,out))."""
    B, state_size = state.shape
    action_size = params[-1][0].shape[1]

    state = state.astype(jnp.float32)
    w_dtype = jnp.bfloat16 if use_bf16 else jnp.float32

    # Batch tile: multiple of the 8-row sublane granule, large enough to
    # amortize per-step overhead, but clamped so the grid has >= 2 steps
    # (keeps both TensorCores busy on v7x; harmless on v5e/v6e).
    two_step = _round_up(pl.cdiv(B, 2), SUBLANE)
    tb = max(SUBLANE, min(tile_b, two_step))
    tb = _round_up(tb, SUBLANE)
    grid = (pl.cdiv(B, tb),)

    flat_args = [state]
    in_specs = [pl.BlockSpec((tb, state_size), lambda i: (i, 0))]
    for w, b in params:
        flat_args.append(w.astype(w_dtype))          # weight cast hoisted out of kernel
        flat_args.append(b.astype(jnp.float32))      # biases stay f32
        # Constant block index -> weights/biases stay resident in VMEM across tiles.
        in_specs.append(pl.BlockSpec(w.shape, lambda i: (0, 0)))
        in_specs.append(pl.BlockSpec(b.shape, lambda i: (0, 0)))

    out_spec = pl.BlockSpec((tb, action_size), lambda i: (i, 0))

    return pl.pallas_call(
        _actor_kernel,
        out_shape=jax.ShapeDtypeStruct((B, action_size), jnp.float32),
        grid=grid,
        in_specs=in_specs,
        out_specs=out_spec,
        compiler_params=pltpu.CompilerParams(
            dimension_semantics=("parallel",)),
    )(*flat_args)


def init_params(key, state_size, action_size, layers):
    """Synthetic init mirroring ActorNetwork.reset_parameters shapes/ranges."""
    sizes = [state_size] + list(layers) + [action_size]
    params = []
    keys = jax.random.split(key, 2 * (len(sizes) - 1))
    for li in range(len(sizes) - 1):
        fan_in, fan_out = sizes[li], sizes[li + 1]
        lim = 1.0 / jnp.sqrt(jnp.float32(fan_in)) if li < len(sizes) - 2 else 3e-3
        w = jax.random.uniform(keys[2 * li], (fan_in, fan_out),
                               minval=-lim, maxval=lim, dtype=jnp.float32)
        b = jax.random.uniform(keys[2 * li + 1], (1, fan_out),
                               minval=-lim, maxval=lim, dtype=jnp.float32)
        params.append((w, b))
    return params


def reference_forward(state, params):
    """Pure-JAX reference for correctness checking."""
    h = state
    for i, (w, b) in enumerate(params):
        h = h @ w + b
        h = jnp.maximum(h, 0.0) if i < len(params) - 1 else jnp.tanh(h)
    return h


if __name__ == "__main__":
    key = jax.random.PRNGKey(0)
    k_param, k_state1, k_state2 = jax.random.split(key, 3)

    state_size = 32
    action_size = 8
    layers = [64, 128, 64]

    params = init_params(k_param, state_size, action_size, layers)

    # Small-batch check (single 8-row tile), exact f32 path, tight tolerance.
    state_small = jax.random.normal(k_state1, (8, state_size), dtype=jnp.float32)
    out_small = jax.block_until_ready(
        actor_forward(state_small, params, use_bf16=False))
    ref_small = reference_forward(state_small, params)
    assert out_small.shape == (8, action_size)
    assert jnp.allclose(out_small, ref_small, atol=1e-4, rtol=1e-4), \
        "f32 small-batch mismatch"

    # Multi-tile batch (B=300 -> tile_b clamped to 152, grid=(2,), partial last
    # tile masked on store), f32 path.
    state_big = jax.random.normal(k_state2, (300, state_size), dtype=jnp.float32)
    out_big = jax.block_until_ready(
        actor_forward(state_big, params, use_bf16=False))
    ref_big = reference_forward(state_big, params)
    assert out_big.shape == (300, action_size)
    assert jnp.allclose(out_big, ref_big, atol=1e-4, rtol=1e-4), \
        "f32 batched mismatch"

    # Default bf16-matmul / f32-accumulate throughput path (loose tolerance).
    out_bf16 = jax.block_until_ready(actor_forward(state_big, params))
    assert out_bf16.shape == (300, action_size)
    assert jnp.allclose(out_bf16, ref_big, atol=5e-2, rtol=5e-2), \
        "bf16 batched mismatch"

    print("KERNEL_OK")
</pallas_src>

<mosaic_0001>
module attributes {stable_mosaic.version = 11 : i64} {
  func.func @_actor_kernel(%arg0: i32, %arg1: memref<8x32xf32, #tpu.memory_space<vmem>>, %arg2: memref<32x64xf32, #tpu.memory_space<vmem>>, %arg3: memref<1x64xf32, #tpu.memory_space<vmem>>, %arg4: memref<64x128xf32, #tpu.memory_space<vmem>>, %arg5: memref<1x128xf32, #tpu.memory_space<vmem>>, %arg6: memref<128x64xf32, #tpu.memory_space<vmem>>, %arg7: memref<1x64xf32, #tpu.memory_space<vmem>>, %arg8: memref<64x8xf32, #tpu.memory_space<vmem>>, %arg9: memref<1x8xf32, #tpu.memory_space<vmem>>, %arg10: memref<8x8xf32, #tpu.memory_space<vmem>>) attributes {dimension_semantics = [#tpu.dimension_semantics<parallel>], iteration_bounds = array<i64: 1>, scalar_prefetch = 0 : i64, scratch_operands = 0 : i64, tpu.core_type = #tpu.core_type<tc>, window_params = [{transform_indices = @transform_0, window_bounds = array<i64: 8, 32>}, {pipeline_mode = #tpu.pipeline_mode<synchronous>, transform_indices = @transform_1, window_bounds = array<i64: 32, 64>}, {pipeline_mode = #tpu.pipeline_mode<synchronous>, transform_indices = @transform_2, window_bounds = array<i64: 1, 64>}, {pipeline_mode = #tpu.pipeline_mode<synchronous>, transform_indices = @transform_3, window_bounds = array<i64: 64, 128>}, {pipeline_mode = #tpu.pipeline_mode<synchronous>, transform_indices = @transform_4, window_bounds = array<i64: 1, 128>}, {pipeline_mode = #tpu.pipeline_mode<synchronous>, transform_indices = @transform_5, window_bounds = array<i64: 128, 64>}, {pipeline_mode = #tpu.pipeline_mode<synchronous>, transform_indices = @transform_6, window_bounds = array<i64: 1, 64>}, {pipeline_mode = #tpu.pipeline_mode<synchronous>, transform_indices = @transform_7, window_bounds = array<i64: 64, 8>}, {pipeline_mode = #tpu.pipeline_mode<synchronous>, transform_indices = @transform_8, window_bounds = array<i64: 1, 8>}, {transform_indices = @transform_9, window_bounds = array<i64: 8, 8>}]} {
    %c0 = arith.constant 0 : index
    %c0_0 = arith.constant 0 : index
    %0 = vector.load %arg1[%c0, %c0_0] : memref<8x32xf32, #tpu.memory_space<vmem>>, vector<8x32xf32>
    %c0_1 = arith.constant 0 : index
    %c0_2 = arith.constant 0 : index
    %1 = vector.load %arg2[%c0_1, %c0_2] : memref<32x64xf32, #tpu.memory_space<vmem>>, vector<32x64xf32>
    %cst = arith.constant dense<0.000000e+00> : vector<8x64xf32>
    %2 = tpu.matmul %0, %1, %cst {dimension_numbers = #tpu.dot_dimension_numbers<[1], [0], [0], [1], [0, 0, 1, 1], [], []>} : vector<8x32xf32>, vector<32x64xf32>, vector<8x64xf32> -> vector<8x64xf32>
    %c0_3 = arith.constant 0 : index
    %c0_4 = arith.constant 0 : index
    %3 = vector.load %arg3[%c0_3, %c0_4] : memref<1x64xf32, #tpu.memory_space<vmem>>, vector<1x64xf32>
    %4 = vector.broadcast %3 : vector<1x64xf32> to vector<8x64xf32>
    %5 = arith.addf %2, %4 : vector<8x64xf32>
    %cst_5 = arith.constant 0.000000e+00 : f32
    %6 = vector.broadcast %cst_5 : f32 to vector<8x64xf32>
    %7 = arith.maximumf %5, %6 : vector<8x64xf32>
    %c0_6 = arith.constant 0 : index
    %c0_7 = arith.constant 0 : index
    %8 = vector.load %arg4[%c0_6, %c0_7] : memref<64x128xf32, #tpu.memory_space<vmem>>, vector<64x128xf32>
    %cst_8 = arith.constant dense<0.000000e+00> : vector<8x128xf32>
    %9 = tpu.matmul %7, %8, %cst_8 {dimension_numbers = #tpu.dot_dimension_numbers<[1], [0], [0], [1], [0, 0, 1, 1], [], []>} : vector<8x64xf32>, vector<64x128xf32>, vector<8x128xf32> -> vector<8x128xf32>
    %c0_9 = arith.constant 0 : index
    %c0_10 = arith.constant 0 : index
    %10 = vector.load %arg5[%c0_9, %c0_10] : memref<1x128xf32, #tpu.memory_space<vmem>>, vector<1x128xf32>
    %11 = vector.broadcast %10 : vector<1x128xf32> to vector<8x128xf32>
    %12 = arith.addf %9, %11 : vector<8x128xf32>
    %cst_11 = arith.constant 0.000000e+00 : f32
    %13 = vector.broadcast %cst_11 : f32 to vector<8x128xf32>
    %14 = arith.maximumf %12, %13 : vector<8x128xf32>
    %c0_12 = arith.constant 0 : index
    %c0_13 = arith.constant 0 : index
    %15 = vector.load %arg6[%c0_12, %c0_13] : memref<128x64xf32, #tpu.memory_space<vmem>>, vector<128x64xf32>
    %cst_14 = arith.constant dense<0.000000e+00> : vector<8x64xf32>
    %16 = tpu.matmul %14, %15, %cst_14 {dimension_numbers = #tpu.dot_dimension_numbers<[1], [0], [0], [1], [0, 0, 1, 1], [], []>} : vector<8x128xf32>, vector<128x64xf32>, vector<8x64xf32> -> vector<8x64xf32>
    %c0_15 = arith.constant 0 : index
    %c0_16 = arith.constant 0 : index
    %17 = vector.load %arg7[%c0_15, %c0_16] : memref<1x64xf32, #tpu.memory_space<vmem>>, vector<1x64xf32>
    %18 = vector.broadcast %17 : vector<1x64xf32> to vector<8x64xf32>
    %19 = arith.addf %16, %18 : vector<8x64xf32>
    %cst_17 = arith.constant 0.000000e+00 : f32
    %20 = vector.broadcast %cst_17 : f32 to vector<8x64xf32>
    %21 = arith.maximumf %19, %20 : vector<8x64xf32>
    %c0_18 = arith.constant 0 : index
    %c0_19 = arith.constant 0 : index
    %22 = vector.load %arg8[%c0_18, %c0_19] : memref<64x8xf32, #tpu.memory_space<vmem>>, vector<64x8xf32>
    %cst_20 = arith.constant dense<0.000000e+00> : vector<8x8xf32>
    %23 = tpu.matmul %21, %22, %cst_20 {dimension_numbers = #tpu.dot_dimension_numbers<[1], [0], [0], [1], [0, 0, 1, 1], [], []>} : vector<8x64xf32>, vector<64x8xf32>, vector<8x8xf32> -> vector<8x8xf32>
    %c0_21 = arith.constant 0 : index
    %c0_22 = arith.constant 0 : index
    %24 = vector.load %arg9[%c0_21, %c0_22] : memref<1x8xf32, #tpu.memory_space<vmem>>, vector<1x8xf32>
    %25 = vector.broadcast %24 : vector<1x8xf32> to vector<8x8xf32>
    %26 = arith.addf %23, %25 : vector<8x8xf32>
    %27 = math.tanh %26 : vector<8x8xf32>
    %c0_23 = arith.constant 0 : index
    %c0_24 = arith.constant 0 : index
    %28 = vector.load %arg10[%c0_23, %c0_24] : memref<8x8xf32, #tpu.memory_space<vmem>>, vector<8x8xf32>
    tpu.vector_store %arg10[%c0_23, %c0_24], %27 {strides = array<i32>} : memref<8x8xf32, #tpu.memory_space<vmem>>, vector<8x8xf32>,
    return
  }
  func.func @transform_0(%arg0: i32) -> (i32, i32) {
    %c0_i32 = arith.constant 0 : i32
    %c0_i32_0 = arith.constant 0 : i32
    return %arg0, %c0_i32 : i32, i32
  }
  func.func @transform_1(%arg0: i32) -> (i32, i32) {
    %c0_i32 = arith.constant 0 : i32
    %c0_i32_0 = arith.constant 0 : i32
    %c0_i32_1 = arith.constant 0 : i32
    return %c0_i32, %c0_i32_0 : i32, i32
  }
  func.func @transform_2(%arg0: i32) -> (i32, i32) {
    %c0_i32 = arith.constant 0 : i32
    %c0_i32_0 = arith.constant 0 : i32
    %c0_i32_1 = arith.constant 0 : i32
    return %c0_i32, %c0_i32_0 : i32, i32
  }
  func.func @transform_3(%arg0: i32) -> (i32, i32) {
    %c0_i32 = arith.constant 0 : i32
    %c0_i32_0 = arith.constant 0 : i32
    %c0_i32_1 = arith.constant 0 : i32
    return %c0_i32, %c0_i32_0 : i32, i32
  }
  func.func @transform_4(%arg0: i32) -> (i32, i32) {
    %c0_i32 = arith.constant 0 : i32
    %c0_i32_0 = arith.constant 0 : i32
    %c0_i32_1 = arith.constant 0 : i32
    return %c0_i32, %c0_i32_0 : i32, i32
  }
  func.func @transform_5(%arg0: i32) -> (i32, i32) {
    %c0_i32 = arith.constant 0 : i32
    %c0_i32_0 = arith.constant 0 : i32
    %c0_i32_1 = arith.constant 0 : i32
    return %c0_i32, %c0_i32_0 : i32, i32
  }
  func.func @transform_6(%arg0: i32) -> (i32, i32) {
    %c0_i32 = arith.constant 0 : i32
    %c0_i32_0 = arith.constant 0 : i32
    %c0_i32_1 = arith.constant 0 : i32
    return %c0_i32, %c0_i32_0 : i32, i32
  }
  func.func @transform_7(%arg0: i32) -> (i32, i32) {
    %c0_i32 = arith.constant 0 : i32
    %c0_i32_0 = arith.constant 0 : i32
    %c0_i32_1 = arith.constant 0 : i32
    return %c0_i32, %c0_i32_0 : i32, i32
  }
  func.func @transform_8(%arg0: i32) -> (i32, i32) {
    %c0_i32 = arith.constant 0 : i32
    %c0_i32_0 = arith.constant 0 : i32
    %c0_i32_1 = arith.constant 0 : i32
    return %c0_i32, %c0_i32_0 : i32, i32
  }
  func.func @transform_9(%arg0: i32) -> (i32, i32) {
    %c0_i32 = arith.constant 0 : i32
    %c0_i32_0 = arith.constant 0 : i32
    return %arg0, %c0_i32 : i32, i32
  }
}

</mosaic_0001>

<bundles_post_ra>
// kernel: actor_forward.1
= control target key start
LH: loop header
LB: loop body
LE: loop exit
PB: predicated region body
PF: predicated region fallthrough
CT: control target
= control target key end

     0   :  { %vm42_vm0 = vcmask 261120   ;;  %s414_s0 = inlined_call_operand.vmem [shape: f32[8,32], index: 0, kind: input, shape index: {}]   ;;  %s415_s1 = inlined_call_operand.vmem [shape: f32[32,64], index: 1, kind: input, shape index: {}]   ;;  %s416_s2 = inlined_call_operand.vmem [shape: f32[1,64], index: 2, kind: input, shape index: {}]   ;;  %s417_s3 = inlined_call_operand.vmem [shape: f32[64,128], index: 3, kind: input, shape index: {}]   ;;  %s418_s4 = inlined_call_operand.vmem [shape: f32[1,128], index: 4, kind: input, shape index: {}]   ;;  %s419_s5 = inlined_call_operand.vmem [shape: f32[128,64], index: 5, kind: input, shape index: {}]   ;;  %s420_s6 = inlined_call_operand.vmem [shape: f32[1,64], index: 6, kind: input, shape index: {}]   ;;  %s421_s7 = inlined_call_operand.vmem [shape: f32[64,8], index: 7, kind: input, shape index: {}]   ;;  %s422_s8 = inlined_call_operand.vmem [shape: f32[1,8], index: 8, kind: input, shape index: {}]   ;;  %s423_s9 = inlined_call_operand.hbm [shape: f32[8,8], index: 9, kind: output, shape index: {}]  }
   0x1   :  { %v37_v0 = vld [vmem:[%s415_s1 + $0x18] sm:$0xff]  ;;  %v36_v1 = vld [vmem:[%s415_s1 + $0x10] sm:$0xff]  ;;  %v35_v3 = vld [vmem:[%s415_s1 + $0x8] sm:$0xff] }
   0x2   :  { %58 = vmatpush.msra.mxu0 %v37_v0  ;;  %v74_v2 = vld [vmem:[%s417_s3 + $0x38] sm:$0xff]  ;;  %v73_v4 = vld [vmem:[%s417_s3 + $0x30] sm:$0xff]  ;;  %v34_v5 = vld [vmem:[%s415_s1] sm:$0xff] }
   0x3   :  { %91 = vmatpush.msra.mxu1 %v74_v2  ;;  %v72_v6 = vld [vmem:[%s417_s3 + $0x28] sm:$0xff]  ;;  %v33_v7 = vld [vmem:[%s414_s0] sm:$0xff] }
   0x4   :  { %59 = vmatpush.msra.mxu0 %v36_v1  ;;  %v71_v8 = vld [vmem:[%s417_s3 + $0x20] sm:$0xff] }
   0x5   :  { %92 = vmatpush.msra.mxu1 %v73_v4 }
   0x6   :  { %60 = vmatpush.msra.mxu0 %v35_v3 }
   0x7   :  { %14 = vsyncpa [#allocation3], 0  ;;  %93 = vmatpush.msra.mxu1 %v72_v6  ;;  %v70_v9 = vld [vmem:[%s417_s3 + $0x18] sm:$0xff]  ;;  %v69_v10 = vld [vmem:[%s417_s3 + $0x10] sm:$0xff]  ;;  %vm79_vm1 = vcmask 523264   ;;  %s235_s17 = smov [#allocation2]  }
   0x8   :  { %61 = vmatpush.msra.mxu0 %v34_v5  ;;  %v68_v11 = vld [vmem:[%s417_s3 + $0x8] sm:$0xff]  ;;  %v67_v12 = vld [vmem:[%s417_s3] sm:$0xff]  ;;  %v119_v13 = vld [vmem:[%s419_s5 + $0x78] sm:$0xff]  ;;  %s188_s18 = sshll.u32 %s235_s17, 4  ;;  %s190_s3 = sshll.u32 %s423_s9, 4  ;;  %vm181_vm2 = vcmask 64512   ;;  %s189_s18 = int_to_ptr.vmem [resolvable:$true] %s188_s18  ;;  %s191_s3 = int_to_ptr.hbm [resolvable:$true] %s190_s3 }
   0x9   :  { %199 = vmatmul.msk.f32.vlgmr.msra.gmra.mxu0 %vm42_vm0, %v33_v7  ;;  %94 = vmatpush.msra.mxu1 %v71_v8  ;;  %v118_v14 = vld [vmem:[%s419_s5 + $0x70] sm:$0xff]  ;;  %v117_v15 = vld [vmem:[%s419_s5 + $0x68] sm:$0xff]  ;;  %v116_v16 = vld [vmem:[%s419_s5 + $0x60] sm:$0xff] }
   0xa   :  { %124 = vmatpush.msra.mxu2 %v119_v13  ;;  %v115_v17 = vld [vmem:[%s419_s5 + $0x58] sm:$0xff]  ;;  %v114_v18 = vld [vmem:[%s419_s5 + $0x50] sm:$0xff]  ;;  %v113_v19 = vld [vmem:[%s419_s5 + $0x48] sm:$0xff] }
   0xb   :  { %95 = vmatpush.msra.mxu1 %v70_v9  ;;  %v112_v20 = vld [vmem:[%s419_s5 + $0x40] sm:$0xff]  ;;  %v111_v21 = vld [vmem:[%s419_s5 + $0x38] sm:$0xff]  ;;  %v110_v22 = vld [vmem:[%s419_s5 + $0x30] sm:$0xff] }
   0xc   :  { %125 = vmatpush.msra.mxu2 %v118_v14  ;;  %v109_v23 = vld [vmem:[%s419_s5 + $0x28] sm:$0xff]  ;;  %v108_v24 = vld [vmem:[%s419_s5 + $0x20] sm:$0xff]  ;;  %v107_v25 = vld [vmem:[%s419_s5 + $0x18] sm:$0xff] }
   0xd   :  { %96 = vmatpush.msra.mxu1 %v69_v10  ;;  %v203_v26 = vld [vmem:[%s416_s2] ss:$0 sm:$0xff]  ;;  %v106_v30 = vld [vmem:[%s419_s5 + $0x10] sm:$0xff]  ;;  %v105_v31 = vld [vmem:[%s419_s5 + $0x8] sm:$0xff] }
   0xe   :  { %126 = vmatpush.msra.mxu2 %v117_v15  ;;  %v104_v32 = vld [vmem:[%s419_s5] sm:$0xff]  ;;  %v152_v33 = vld [vmem:[%s421_s7 + $0x38] sm:$0xff]  ;;  %v151_v34 = vld [vmem:[%s421_s7 + $0x30] sm:$0xff] }
   0xf   :  { %97 = vmatpush.msra.mxu1 %v68_v11  ;;  %168 = vmatpush.msra.mxu3 %v152_v33  ;;  %v150_v35 = vld [vmem:[%s421_s7 + $0x28] sm:$0xff]  ;;  %v149_v36 = vld [vmem:[%s421_s7 + $0x20] sm:$0xff]  ;;  %v148_v37 = vld [vmem:[%s421_s7 + $0x18] sm:$0xff] }
  0x10   :  { %127 = vmatpush.msra.mxu2 %v116_v16  ;;  %v204_v38 = vld [vmem:[%s418_s4] ss:$0 sm:$0xff]  ;;  %v147_v42 = vld [vmem:[%s421_s7 + $0x10] sm:$0xff]  ;;  %v146_v43 = vld [vmem:[%s421_s7 + $0x8] sm:$0xff] }
  0x11   :  { %98 = vmatpush.msra.mxu1 %v67_v12  ;;  %169 = vmatpush.msra.mxu3 %v151_v34  ;;  %v145_v44 = vld [vmem:[%s421_s7] sm:$0xff] }
  0x12   :  { %128 = vmatpush.msra.mxu2 %v115_v17  ;;  %v205_v45 = vld [vmem:[%s420_s6] ss:$0 sm:$0xff] }
  0x13   :  { %170 = vmatpush.msra.mxu3 %v150_v35  ;;  %v206_v49 = vld [vmem:[%s422_s8] ss:$0 sm:$0xff] }
  0x14   :  { %129 = vmatpush.msra.mxu2 %v114_v18 }
  0x15   :  { %171 = vmatpush.msra.mxu3 %v149_v36 }
  0x16   :  { %130 = vmatpush.msra.mxu2 %v113_v19 }
  0x17   :  { %172 = vmatpush.msra.mxu3 %v148_v37 }
  0x18   :  { %131 = vmatpush.msra.mxu2 %v112_v20 }
  0x19   :  { %173 = vmatpush.msra.mxu3 %v147_v42 }
  0x1a   :  { %132 = vmatpush.msra.mxu2 %v111_v21 }
  0x1b   :  { %174 = vmatpush.msra.mxu3 %v146_v43 }
  0x1c   :  { %133 = vmatpush.msra.mxu2 %v110_v22 }
  0x1d   :  { %175 = vmatpush.msra.mxu3 %v145_v44 }
  0x1e   :  { %134 = vmatpush.msra.mxu2 %v109_v23 }
  0x20   :  { %135 = vmatpush.msra.mxu2 %v108_v24 }
  0x22   :  { %136 = vmatpush.msra.mxu2 %v107_v25 }
  0x24   :  { %137 = vmatpush.msra.mxu2 %v106_v30 }
  0x26   :  { %138 = vmatpush.msra.mxu2 %v105_v31 }
  0x28   :  { %139 = vmatpush.msra.mxu2 %v104_v32 }
  0x86   :  { %v63_v27 = vpop.f32.mrf.mxu0 }
  0x87   :  { %v64_v28 = vadd.f32 %v203_v26, %v63_v27 }
  0x89   :  { %v66_v29 = vmax.f32 %v64_v28, 0.0 }
  0x8b   :  { %200 = vmatmul.msk.f32.vlgmr.msra.gmra.mxu1 %vm79_vm1, %v66_v29 }
 0x108   :  { %v100_v39 = vpop.f32.mrf.mxu1 }
 0x109   :  { %v101_v40 = vadd.f32 %v204_v38, %v100_v39 }
 0x10b   :  { %v103_v41 = vmax.f32 %v101_v40, 0.0 }
 0x10d   :  { %140 = vmatmul.f32.vlgmr.msra.gmra.mxu2 %v103_v41 }
 0x190   :  { %v141_v46 = vpop.f32.mrf.mxu2 }
 0x191   :  { %v142_v47 = vadd.f32 %v205_v45, %v141_v46 }
 0x193   :  { %v144_v48 = vmax.f32 %v142_v47, 0.0 }
 0x195   :  { %201 = vmatmul.msk.f32.vlgmr.msra.gmra.mxu3 %vm79_vm1, %v144_v48 }
 0x218   :  { %v177_v50 = vpop.f32.mrf.mxu3 }
 0x219   :  { %v178_v51 = vadd.f32 %v206_v49, %v177_v50 }
 0x21b   :  { %207 = vtanh.f32 %v178_v51 }
 0x221   :  { %v208_v52 = vpop.eup %207 }
 0x222   :  { %182 = vst.msk [vmem:[#allocation2] sm:$0xff] %vm181_vm2, %v208_v52 }
 0x223   :  { %193 = dma.vmem_to_hbm [thread:$0]  %s189_s18, 128, %s191_s3, [#allocation3]  }
 0x224   :  { %233 = dma.done.wait [#allocation3], 128  }
 0x225   :  { %234 = vsyncadd [#allocation3], 4294967168 }
 0x226   :  { %198 = vsyncpa [#allocation3], 1 }

</bundles_post_ra>
